<compile_context>
chip_gen: v6e
topology: v6e:2x2x1
jax: 0.10.0
libtpu: 0.0.40
codegen_flags: <defaults>
</compile_context>

<pallas_src>
import functools

import jax
import jax.numpy as jnp
from jax.experimental import pallas as pl
from jax.experimental.pallas import tpu as pltpu


def _round_up(n, m):
    return ((n + m - 1) // m) * m


# ----------------------------------------------------------------------------
# Capability / budget probes (host-side, cached)
# ----------------------------------------------------------------------------
def _probe_copy_kernel(x_ref, o_ref):
    o_ref[...] = x_ref[...]


@functools.lru_cache(maxsize=None)
def _buffered_one_supported():
    """True if BlockSpec(pipeline_mode=pl.Buffered(1)) lowers and runs here."""
    try:
        spec = pl.BlockSpec((8, 128), lambda i: (0, 0),
                            pipeline_mode=pl.Buffered(1))
        fn = pl.pallas_call(
            _probe_copy_kernel,
            out_shape=jax.ShapeDtypeStruct((8, 128), jnp.float32),
            grid=(2,),
            in_specs=[spec],
            out_specs=pl.BlockSpec((8, 128), lambda i: (0, 0)),
        )
        jax.block_until_ready(fn(jnp.ones((8, 128), jnp.float32)))
        return True
    except Exception:
        return False


def _resident_spec(block_shape, index_map):
    """Constant-index (resident) block; single-buffered when supported."""
    if _buffered_one_supported():
        return pl.BlockSpec(block_shape, index_map,
                            pipeline_mode=pl.Buffered(1))
    return pl.BlockSpec(block_shape, index_map)


@functools.lru_cache(maxsize=None)
def _vmem_budget_bytes():
    """~3/4 of physical VMEM (per-generation cap for vmem_limit_bytes)."""
    phys = 128 << 20
    try:
        info = pltpu.get_tpu_info()
        p = int(getattr(info, "vmem_capacity_bytes", 0) or 0)
        if p > 0:
            phys = p
    except Exception:
        pass
    return (phys * 3) // 4


# ----------------------------------------------------------------------------
# Haar wavelet transform kernel (level-1 2D DWT) — off the forward hot path
# ----------------------------------------------------------------------------
def _haar_kernel(a_ref, b_ref, c_ref, d_ref, ll_ref, lh_ref, hl_ref, hh_ref):
    a = a_ref[...]
    b = b_ref[...]
    c = c_ref[...]
    d = d_ref[...]
    ll_ref[...] = (a + b + c + d) * 0.5
    lh_ref[...] = (a - b + c - d) * 0.5
    hl_ref[...] = (a + b - c - d) * 0.5
    hh_ref[...] = (a - b - c + d) * 0.5


@jax.jit
def haar_wavelet_transform(x):
    """Level-1 Haar DWT of NCHW input; subbands packed in quadrants (LL|LH / HL|HH)."""
    B, C, H, W = x.shape
    h2, w2 = H // 2, W // 2
    q = C * h2 * w2  # fold C into the lane axis -> lane-dense stores

    # Polyphase split + flatten (XLA-side layout plumbing).  This transform is
    # dead code in the reference forward(), so it stays off the hot path.
    # TODO(synk): if this returns to the hot path, move the stride-2 split
    # in-kernel via ref[pl.ds(..., stride=2)] and tile over B*C with
    # sublane-multiple-of-8 blocks.
    a = x[:, :, 0::2, 0::2].reshape(B, q)
    b = x[:, :, 0::2, 1::2].reshape(B, q)
    c = x[:, :, 1::2, 0::2].reshape(B, q)
    d = x[:, :, 1::2, 1::2].reshape(B, q)

    vmem = pl.BlockSpec(memory_space=pltpu.MemorySpace.VMEM)
    sub_shape = jax.ShapeDtypeStruct((B, q), x.dtype)
    ll, lh, hl, hh = pl.pallas_call(
        _haar_kernel,
        out_shape=(sub_shape, sub_shape, sub_shape, sub_shape),
        in_specs=[vmem, vmem, vmem, vmem],
        out_specs=(vmem, vmem, vmem, vmem),
    )(a, b, c, d)

    ll = ll.reshape(B, C, h2, w2)
    lh = lh.reshape(B, C, h2, w2)
    hl = hl.reshape(B, C, h2, w2)
    hh = hh.reshape(B, C, h2, w2)
    top = jnp.concatenate([ll, lh], axis=3)
    bot = jnp.concatenate([hl, hh], axis=3)
    return jnp.concatenate([top, bot], axis=2)


# ----------------------------------------------------------------------------
# MLP head kernels: relu(fc1) -> relu(fc2) -> log_softmax(fc3, dim=1)
#   * bf16 weights, f32 accumulation (preferred_element_type).
#   * Padded fc3 lanes carry -1e30 via the padded bias (no in-kernel mask).
# ----------------------------------------------------------------------------
def _mlp_tail(h2, w3_ref, b3_ref):
    logits = (jnp.dot(h2.astype(jnp.bfloat16), w3_ref[...],
                      preferred_element_type=jnp.float32) + b3_ref[...])
    m = jnp.max(logits, axis=1, keepdims=True)
    z = logits - m
    lse = jnp.log(jnp.sum(jnp.exp(z), axis=1, keepdims=True))
    return z - lse


def _mlp_resident_kernel(x_ref, w1_ref, b1_ref, w2_ref, b2_ref, w3_ref, b3_ref,
                         *refs, return_features):
    if return_features:
        h1_ref, h2_ref, out_ref = refs
    else:
        (out_ref,) = refs
    x = x_ref[...].astype(jnp.bfloat16)
    h1 = jnp.maximum(
        jnp.dot(x, w1_ref[...], preferred_element_type=jnp.float32)
        + b1_ref[...], 0.0)
    h2 = jnp.maximum(
        jnp.dot(h1.astype(jnp.bfloat16), w2_ref[...],
                preferred_element_type=jnp.float32)
        + b2_ref[...], 0.0)
    logp = _mlp_tail(h2, w3_ref, b3_ref)
    if return_features:
        h1_ref[...] = h1.astype(h1_ref.dtype)
        h2_ref[...] = h2.astype(h2_ref.dtype)
    out_ref[...] = logp.astype(out_ref.dtype)


def _mlp_ktiled_kernel(x_ref, w1_ref, b1_ref, w2_ref, b2_ref, w3_ref, b3_ref,
                       *refs, return_features):
    if return_features:
        h1_ref, h2_ref, out_ref, acc_ref = refs
    else:
        out_ref, acc_ref = refs
    k = pl.program_id(1)

    @pl.when(k == 0)
    def _():
        acc_ref[...] = jnp.zeros_like(acc_ref)

    acc_ref[...] += jnp.dot(x_ref[...].astype(jnp.bfloat16), w1_ref[...],
                            preferred_element_type=jnp.float32)

    @pl.when(k == pl.num_programs(1) - 1)
    def _():
        h1 = jnp.maximum(acc_ref[...] + b1_ref[...], 0.0)
        h2 = jnp.maximum(
            jnp.dot(h1.astype(jnp.bfloat16), w2_ref[...],
                    preferred_element_type=jnp.float32)
            + b2_ref[...], 0.0)
        logp = _mlp_tail(h2, w3_ref, b3_ref)
        if return_features:
            h1_ref[...] = h1.astype(h1_ref.dtype)
            h2_ref[...] = h2.astype(h2_ref.dtype)
        out_ref[...] = logp.astype(out_ref.dtype)


def mlp_head(x_flat, params, return_features=False, k_tile=None,
             features_dtype=jnp.float32):
    """relu(fc1)->relu(fc2)->log_softmax(fc3).  x_flat may be f32 or bf16
    (kernel casts to bf16 for the MXU either way; passing bf16 halves the
    streamed activation DMA)."""
    w1, b1, w2, b2, w3, b3 = params          # weights bf16 pre-transposed, biases f32
    B, in_dim = x_flat.shape
    hidden = w1.shape[1]                     # correct even if not a multiple of 128
    out_dim = w3.shape[1]

    # Lane-dense fc3: pad output width to a multiple of 128.  Padded lanes get
    # logits == -1e30 automatically (zero w3 columns + -1e30 bias), so no
    # in-kernel mask is needed; they are sliced off in the wrapper.
    npad = _round_up(max(out_dim, 128), 128)
    w3p = jnp.pad(w3, ((0, 0), (0, npad - out_dim)))
    b3p = jnp.pad(b3, ((0, 0), (0, npad - out_dim)), constant_values=-1e30)

    # Batch tiling: 256 rows fills the 256-wide MXU M-dim on v6e/v7x when the
    # batch is large; otherwise <=128 rows keeps >=2 grid steps for megacore.
    if B >= 512:
        TB = 256
    else:
        TB = min(128, _round_up(B, 8))
    Bp = _round_up(B, TB)
    if Bp != B:
        x_flat = jnp.pad(x_flat, ((0, Bp - B), (0, 0)))
    nb = Bp // TB

    budget = _vmem_budget_bytes()
    wbuf = 1 if _buffered_one_supported() else 2
    wib = jnp.dtype(w1.dtype).itemsize
    w1_bytes = in_dim * hidden * wib

    use_ktile = (k_tile is not None) or (wbuf * w1_bytes > budget // 3)

    if use_ktile:
        if k_tile is None:
            # Double-buffered (tk, hidden) w1 stream sized to ~budget/6.
            tk = (budget // 6) // max(1, 2 * hidden * wib)
            tk = max(128, min(_round_up(in_dim, 128), (tk // 128) * 128))
        else:
            tk = int(k_tile)
        Kp = _round_up(in_dim, tk)
        if Kp != in_dim:   # zero K-padding is exact (adds 0 to the dot)
            x_flat = jnp.pad(x_flat, ((0, 0), (0, Kp - in_dim)))
            w1 = jnp.pad(w1, ((0, Kp - in_dim), (0, 0)))
        nk = Kp // tk

        in_specs = [
            pl.BlockSpec((TB, tk), lambda i, k: (i, k)),
            pl.BlockSpec((tk, hidden), lambda i, k: (k, 0)),      # streamed
            _resident_spec((1, hidden), lambda i, k: (0, 0)),
            _resident_spec((hidden, hidden), lambda i, k: (0, 0)),
            _resident_spec((1, hidden), lambda i, k: (0, 0)),
            _resident_spec((hidden, npad), lambda i, k: (0, 0)),
            _resident_spec((1, npad), lambda i, k: (0, 0)),
        ]
        out_spec_logp = pl.BlockSpec((TB, npad), lambda i, k: (i, 0))
        h_spec = pl.BlockSpec((TB, hidden), lambda i, k: (i, 0))
        grid = (nb, nk)
        dims = ("parallel", "arbitrary")     # reduction axis last
        scratch = [pltpu.VMEM((TB, hidden), jnp.float32)]
        kernel = functools.partial(_mlp_ktiled_kernel,
                                   return_features=return_features)
        k_blk = tk
        w1_buf = 2
    else:
        in_specs = [
            pl.BlockSpec((TB, in_dim), lambda i: (i, 0)),
            _resident_spec((in_dim, hidden), lambda i: (0, 0)),
            _resident_spec((1, hidden), lambda i: (0, 0)),
            _resident_spec((hidden, hidden), lambda i: (0, 0)),
            _resident_spec((1, hidden), lambda i: (0, 0)),
            _resident_spec((hidden, npad), lambda i: (0, 0)),
            _resident_spec((1, npad), lambda i: (0, 0)),
        ]
        out_spec_logp = pl.BlockSpec((TB, npad), lambda i: (i, 0))
        h_spec = pl.BlockSpec((TB, hidden), lambda i: (i, 0))
        grid = (nb,)
        dims = ("parallel",)
        scratch = []
        kernel = functools.partial(_mlp_resident_kernel,
                                   return_features=return_features)
        k_blk = in_dim
        w1_buf = wbuf

    # Explicit scoped-VMEM limit computed from the actual block sizes.
    x_bytes = jnp.dtype(x_flat.dtype).itemsize
    feat_bytes = jnp.dtype(features_dtype).itemsize
    est = 0
    est += 2 * TB * k_blk * x_bytes                  # streamed x tile
    est += w1_buf * k_blk * hidden * wib             # w1 block(s)
    est += wbuf * hidden * hidden * wib              # w2
    est += wbuf * hidden * npad * wib                # w3
    est += wbuf * (2 * hidden + npad) * 4            # biases
    est += 2 * TB * npad * 4                         # out tile
    if return_features:
        est += 2 * 2 * TB * hidden * feat_bytes      # h1/h2 tiles
    est += TB * hidden * 4                           # f32 accumulator scratch
    est += TB * (2 * hidden + npad) * 6              # in-kernel f32+bf16 temps
    vmem_limit = int(min(budget, max(est * 3 // 2 + (8 << 20), 32 << 20)))

    cparams = pltpu.CompilerParams(dimension_semantics=dims,
                                   vmem_limit_bytes=vmem_limit)

    if return_features:
        out_shapes = (jax.ShapeDtypeStruct((Bp, hidden), features_dtype),
                      jax.ShapeDtypeStruct((Bp, hidden), features_dtype),
                      jax.ShapeDtypeStruct((Bp, npad), jnp.float32))
        out_specs = (h_spec, h_spec, out_spec_logp)
        h1, h2, out = pl.pallas_call(
            kernel,
            out_shape=out_shapes,
            grid=grid,
            in_specs=in_specs,
            out_specs=out_specs,
            scratch_shapes=scratch,
            compiler_params=cparams,
        )(x_flat, w1, b1, w2, b2, w3p, b3p)
        return h1[:B], h2[:B], out[:B, :out_dim]

    out = pl.pallas_call(
        kernel,
        out_shape=jax.ShapeDtypeStruct((Bp, npad), jnp.float32),
        grid=grid,
        in_specs=in_specs,
        out_specs=out_spec_logp,
        scratch_shapes=scratch,
        compiler_params=cparams,
    )(x_flat, w1, b1, w2, b2, w3p, b3p)
    return out[:B, :out_dim]


# ----------------------------------------------------------------------------
# Module-level forward (parameter setup / reshapes stay in plain JAX)
# ----------------------------------------------------------------------------
def init_wavelet_ribbon_params(key, input_size, output_size,
                               weight_dtype=jnp.bfloat16):
    """Deterministic PyTorch-default Linear init.  Weights stored pre-transposed (bf16)."""
    hidden = input_size // 4

    def linear(key, fan_in, fan_out):
        kw, kb = jax.random.split(key)
        bound = 1.0 / jnp.sqrt(jnp.float32(fan_in))
        w_t = jax.random.uniform(kw, (fan_in, fan_out), jnp.float32,
                                 -bound, bound).astype(weight_dtype)  # torch weight .T
        b = jax.random.uniform(kb, (1, fan_out), jnp.float32, -bound, bound)
        return w_t, b

    k1, k2, k3 = jax.random.split(key, 3)
    w1, b1 = linear(k1, input_size, hidden)    # fc1
    w2, b2 = linear(k2, hidden, hidden)        # fc2 (same shape as latent_layers[i])
    w3, b3 = linear(k3, hidden, output_size)   # fc3 (same shape as q1)
    return (w1, b1, w2, b2, w3, b3)
    # TODO(synk): latent_layers[1:] exist in __init__ but are unused by forward().


@functools.partial(jax.jit, static_argnames=("return_features", "k_tile"))
def wavelet_ribbon_forward(x, params, return_features=False, k_tile=None):
    B = x.shape[0]
    # The reference forward() computes haar_wavelet_transform(x) and slices it
    # into ll/lh/hl/hh variables that are never used.  That dead intermediate
    # is not materialized here; haar_wavelet_transform() above is the
    # standalone Pallas implementation of that transform.
    x_flat = x.reshape(B, -1)
    return mlp_head(x_flat, params, return_features=return_features,
                    k_tile=k_tile)


# ----------------------------------------------------------------------------
# Pure-JAX references for correctness checking
# ----------------------------------------------------------------------------
def _reference_forward(x, params):
    w1, b1, w2, b2, w3, b3 = params
    B = x.shape[0]
    xf = x.reshape(B, -1).astype(w1.dtype)
    h1 = jnp.maximum(jnp.dot(xf, w1, preferred_element_type=jnp.float32) + b1, 0.0)
    h2 = jnp.maximum(jnp.dot(h1.astype(w2.dtype), w2,
                             preferred_element_type=jnp.float32) + b2, 0.0)
    logits = jnp.dot(h2.astype(w3.dtype), w3,
                     preferred_element_type=jnp.float32) + b3
    return jax.nn.log_softmax(logits, axis=1), h1, h2


def _reference_haar(x):
    a = x[:, :, 0::2, 0::2]
    b = x[:, :, 0::2, 1::2]
    c = x[:, :, 1::2, 0::2]
    d = x[:, :, 1::2, 1::2]
    ll = (a + b + c + d) * 0.5
    lh = (a - b + c - d) * 0.5
    hl = (a + b - c - d) * 0.5
    hh = (a - b - c + d) * 0.5
    top = jnp.concatenate([ll, lh], axis=3)
    bot = jnp.concatenate([hl, hh], axis=3)
    return jnp.concatenate([top, bot], axis=2)


if __name__ == "__main__":
    B, C, H, W = 2, 4, 16, 16
    input_size = C * H * W        # 1024
    output_size = 10
    depth = 3                     # unused by forward, kept for interface parity

    key = jax.random.PRNGKey(0)
    kx, kp = jax.random.split(key)
    x = jax.random.normal(kx, (B, C, H, W), jnp.float32)
    params = init_wavelet_ribbon_params(kp, input_size, output_size)

    # Standalone Haar kernel (not materialized on the forward hot path).
    wav = haar_wavelet_transform(x)

    # Resident-weight path.
    out = wavelet_ribbon_forward(x, params, return_features=False)
    h1, h2, out_f = wavelet_ribbon_forward(x, params, return_features=True)
    # Forced K-tiled fc1 path (what large in_dim / v7x VMEM limits would select).
    out_k = wavelet_ribbon_forward(x, params, return_features=False, k_tile=512)
    h1k, h2k, out_fk = wavelet_ribbon_forward(x, params, return_features=True,
                                              k_tile=512)
    jax.block_until_ready((wav, out, h1, h2, out_f, out_k, h1k, h2k, out_fk))

    # Correctness checks against pure-JAX references.
    wav_ref = _reference_haar(x)
    out_ref, h1_ref, h2_ref = _reference_forward(x, params)

    assert wav.shape == (B, C, H, W)
    assert out.shape == (B, output_size)
    assert jnp.allclose(wav, wav_ref, atol=1e-5, rtol=1e-5), "haar mismatch"
    assert jnp.allclose(out, out_ref, atol=2e-3, rtol=2e-3), "log_softmax mismatch"
    assert jnp.allclose(out_f, out_ref, atol=2e-3, rtol=2e-3), "features-path logits mismatch"
    assert jnp.allclose(h1, h1_ref, atol=2e-3, rtol=2e-3), "h1 mismatch"
    assert jnp.allclose(h2, h2_ref, atol=2e-3, rtol=2e-3), "h2 mismatch"
    assert jnp.allclose(out_k, out_ref, atol=2e-3, rtol=2e-3), "k-tiled logits mismatch"
    assert jnp.allclose(out_fk, out_ref, atol=2e-3, rtol=2e-3), "k-tiled features logits mismatch"
    assert jnp.allclose(h1k, h1_ref, atol=2e-3, rtol=2e-3), "k-tiled h1 mismatch"
    assert jnp.allclose(h2k, h2_ref, atol=2e-3, rtol=2e-3), "k-tiled h2 mismatch"

    print("KERNEL_OK")
</pallas_src>

<mosaic_0001>
module attributes {stable_mosaic.version = 11 : i64} {
  func.func @_haar_kernel(%arg0: memref<2x256xf32, #tpu.memory_space<vmem>>, %arg1: memref<2x256xf32, #tpu.memory_space<vmem>>, %arg2: memref<2x256xf32, #tpu.memory_space<vmem>>, %arg3: memref<2x256xf32, #tpu.memory_space<vmem>>, %arg4: memref<2x256xf32, #tpu.memory_space<vmem>>, %arg5: memref<2x256xf32, #tpu.memory_space<vmem>>, %arg6: memref<2x256xf32, #tpu.memory_space<vmem>>, %arg7: memref<2x256xf32, #tpu.memory_space<vmem>>) attributes {dimension_semantics = [], scalar_prefetch = 0 : i64, scratch_operands = 0 : i64, tpu.core_type = #tpu.core_type<tc>} {
    %c0 = arith.constant 0 : index
    %c0_0 = arith.constant 0 : index
    %0 = vector.load %arg0[%c0, %c0_0] : memref<2x256xf32, #tpu.memory_space<vmem>>, vector<2x256xf32>
    %c0_1 = arith.constant 0 : index
    %c0_2 = arith.constant 0 : index
    %1 = vector.load %arg1[%c0_1, %c0_2] : memref<2x256xf32, #tpu.memory_space<vmem>>, vector<2x256xf32>
    %c0_3 = arith.constant 0 : index
    %c0_4 = arith.constant 0 : index
    %2 = vector.load %arg2[%c0_3, %c0_4] : memref<2x256xf32, #tpu.memory_space<vmem>>, vector<2x256xf32>
    %c0_5 = arith.constant 0 : index
    %c0_6 = arith.constant 0 : index
    %3 = vector.load %arg3[%c0_5, %c0_6] : memref<2x256xf32, #tpu.memory_space<vmem>>, vector<2x256xf32>
    %4 = arith.addf %0, %1 : vector<2x256xf32>
    %5 = arith.addf %4, %2 : vector<2x256xf32>
    %6 = arith.addf %5, %3 : vector<2x256xf32>
    %cst = arith.constant 5.000000e-01 : f32
    %7 = vector.broadcast %cst : f32 to vector<2x256xf32>
    %8 = arith.mulf %6, %7 : vector<2x256xf32>
    %c0_7 = arith.constant 0 : index
    %c0_8 = arith.constant 0 : index
    %9 = vector.load %arg4[%c0_7, %c0_8] : memref<2x256xf32, #tpu.memory_space<vmem>>, vector<2x256xf32>
    tpu.vector_store %arg4[%c0_7, %c0_8], %8 {strides = array<i32>} : memref<2x256xf32, #tpu.memory_space<vmem>>, vector<2x256xf32>,
    %10 = arith.subf %0, %1 : vector<2x256xf32>
    %11 = arith.addf %10, %2 : vector<2x256xf32>
    %12 = arith.subf %11, %3 : vector<2x256xf32>
    %cst_9 = arith.constant 5.000000e-01 : f32
    %13 = vector.broadcast %cst_9 : f32 to vector<2x256xf32>
    %14 = arith.mulf %12, %13 : vector<2x256xf32>
    %c0_10 = arith.constant 0 : index
    %c0_11 = arith.constant 0 : index
    %15 = vector.load %arg5[%c0_10, %c0_11] : memref<2x256xf32, #tpu.memory_space<vmem>>, vector<2x256xf32>
    tpu.vector_store %arg5[%c0_10, %c0_11], %14 {strides = array<i32>} : memref<2x256xf32, #tpu.memory_space<vmem>>, vector<2x256xf32>,
    %16 = arith.addf %0, %1 : vector<2x256xf32>
    %17 = arith.subf %16, %2 : vector<2x256xf32>
    %18 = arith.subf %17, %3 : vector<2x256xf32>
    %cst_12 = arith.constant 5.000000e-01 : f32
    %19 = vector.broadcast %cst_12 : f32 to vector<2x256xf32>
    %20 = arith.mulf %18, %19 : vector<2x256xf32>
    %c0_13 = arith.constant 0 : index
    %c0_14 = arith.constant 0 : index
    %21 = vector.load %arg6[%c0_13, %c0_14] : memref<2x256xf32, #tpu.memory_space<vmem>>, vector<2x256xf32>
    tpu.vector_store %arg6[%c0_13, %c0_14], %20 {strides = array<i32>} : memref<2x256xf32, #tpu.memory_space<vmem>>, vector<2x256xf32>,
    %22 = arith.subf %0, %1 : vector<2x256xf32>
    %23 = arith.subf %22, %2 : vector<2x256xf32>
    %24 = arith.addf %23, %3 : vector<2x256xf32>
    %cst_15 = arith.constant 5.000000e-01 : f32
    %25 = vector.broadcast %cst_15 : f32 to vector<2x256xf32>
    %26 = arith.mulf %24, %25 : vector<2x256xf32>
    %c0_16 = arith.constant 0 : index
    %c0_17 = arith.constant 0 : index
    %27 = vector.load %arg7[%c0_16, %c0_17] : memref<2x256xf32, #tpu.memory_space<vmem>>, vector<2x256xf32>
    tpu.vector_store %arg7[%c0_16, %c0_17], %26 {strides = array<i32>} : memref<2x256xf32, #tpu.memory_space<vmem>>, vector<2x256xf32>,
    return
  }
}

</mosaic_0001>

<bundles_post_ra>
// kernel: haar_wavelet_transform.1
= control target key start
LH: loop header
LB: loop body
LE: loop exit
PB: predicated region body
PF: predicated region fallthrough
CT: control target
= control target key end

     0   :  { %s123_s0 = inlined_call_operand.vmem [shape: f32[2,256], index: 0, kind: input, shape index: {}]   ;;  %s124_s1 = inlined_call_operand.vmem [shape: f32[2,256], index: 1, kind: input, shape index: {}]   ;;  %s125_s2 = inlined_call_operand.vmem [shape: f32[2,256], index: 2, kind: input, shape index: {}]   ;;  %s126_s3 = inlined_call_operand.vmem [shape: f32[2,256], index: 3, kind: input, shape index: {}]   ;;  %s127_s4 = inlined_call_operand.vmem [shape: f32[2,256], index: 4, kind: output, shape index: {0}]   ;;  %s128_s5 = inlined_call_operand.vmem [shape: f32[2,256], index: 5, kind: output, shape index: {1}]   ;;  %s129_s6 = inlined_call_operand.vmem [shape: f32[2,256], index: 6, kind: output, shape index: {2}]   ;;  %s130_s7 = inlined_call_operand.vmem [shape: f32[2,256], index: 7, kind: output, shape index: {3}]  }
   0x1   :  { %v21_v0 = vld [vmem:[%s123_s0] sm:$0xf] }
   0x2   :  { %v22_v1 = vld [vmem:[%s124_s1] sm:$0xf] }
   0x3   :  { %v23_v2 = vld [vmem:[%s125_s2] sm:$0xf]  ;;  %v25_v3 = vadd.f32 %v22_v1, %v21_v0  ;;  %v30_v4 = vsub.f32 %v21_v0, %v22_v1 }
   0x4   :  { %v24_v5 = vld [vmem:[%s126_s3] sm:$0xf] }
   0x5   :  { %v26_v6 = vadd.f32 %v25_v3, %v23_v2  ;;  %v31_v7 = vadd.f32 %v30_v4, %v23_v2  ;;  %v35_v8 = vsub.f32 %v25_v3, %v23_v2  ;;  %v39_v9 = vsub.f32 %v30_v4, %v23_v2 }
   0x7   :  { %v27_v10 = vadd.f32 %v26_v6, %v24_v5  ;;  %v32_v11 = vsub.f32 %v31_v7, %v24_v5  ;;  %v36_v12 = vsub.f32 %v35_v8, %v24_v5  ;;  %v40_v13 = vadd.f32 %v39_v9, %v24_v5 }
   0x9   :  { %v28_v14 = vmul.f32 0.5, %v27_v10  ;;  %v33_v15 = vmul.f32 0.5, %v32_v11  ;;  %v37_v16 = vmul.f32 0.5, %v36_v12  ;;  %v41_v17 = vmul.f32 0.5, %v40_v13 }
   0xb   :  { %29 = vst [vmem:[%s127_s4] sm:$0xf] %v28_v14  ;;  %34 = vst [vmem:[%s128_s5] sm:$0xf] %v33_v15 }
   0xc   :  { %38 = vst [vmem:[%s129_s6] sm:$0xf] %v37_v16  ;;  %42 = vst [vmem:[%s130_s7] sm:$0xf] %v41_v17 }

</bundles_post_ra>
